<compile_context>
chip_gen: v7x
topology: tpu7x:2x2x1
jax: 0.10.0
libtpu: 0.0.40
codegen_flags: <defaults>
</compile_context>

<pallas_src>
import functools

import jax
import jax.numpy as jnp
from jax import lax
from jax.experimental import pallas as pl
from jax.experimental.pallas import tpu as pltpu

LANES = 128                                # lane width of the flattened slab
TARGET_BLOCK_BYTES = 4 * 1024 * 1024       # per-input, per-block VMEM footprint
VMEM_LIMIT_BYTES = 32 * 1024 * 1024        # explicit scoped-VMEM budget
MIN_KERNEL_ELEMS = 64 * 1024               # below this, fused XLA wins


def _tensorcore_count():
    """Best-effort TensorCore count: 2 on v7x-class chips, else 1."""
    try:
        dev = jax.devices()[0]
        if dev.platform != "tpu":
            return 1
        kind = str(getattr(dev, "device_kind", "")).lower()
        return 2 if ("v7" in kind or "7x" in kind) else 1
    except Exception:  # pragma: no cover - defensive; 1 is always correct
        return 1


def _mae_partial_kernel(p_ref, g_ref, o_ref, *, rows_total, row_tile,
                        blocks_per_slice, needs_mask):
    """Accumulate sum(|p - g|) for one parallel slice into an (8, LANES)
    vreg-shaped f32 partial-sum output block (output-as-accumulator)."""
    j = pl.program_id(1)

    @pl.when(j == 0)
    def _():
        o_ref[...] = jnp.zeros_like(o_ref)

    # Upcast in-register; inputs stream from HBM in their original dtype.
    d = jnp.abs(p_ref[...].astype(jnp.float32) - g_ref[...].astype(jnp.float32))

    if needs_mask:
        # Logical (unclamped) block index: rows past the end of the real data
        # (partial edge block or phantom block) must contribute zero.
        i = pl.program_id(0)
        blk = i * blocks_per_slice + j
        valid = rows_total - blk * row_tile

        # Runtime-gate the masking: bulk steps skip the iota/compare/select
        # entirely; only the edge / phantom step pays for it.
        @pl.when(valid >= row_tile)
        def _():
            o_ref[...] += d.reshape(-1, 8, LANES).sum(axis=0)

        @pl.when(valid < row_tile)
        def _():
            row_idx = lax.broadcasted_iota(jnp.int32, d.shape, 0)
            dm = jnp.where(row_idx < valid, d, 0.0)
            o_ref[...] += dm.reshape(-1, 8, LANES).sum(axis=0)
    else:
        # Vreg-shaped accumulation: only VPU adds per grid step; the single
        # expensive cross-lane reduce happens once in the wrapper.
        o_ref[...] += d.reshape(-1, 8, LANES).sum(axis=0)


def _abs_diff_sum(p_flat, g_flat, *, block_rows=None, num_slices=None,
                  min_kernel_elems=MIN_KERNEL_ELEMS):
    """sum(|p - g|) over flat 1-D arrays: bulk via Pallas, tiny tail in JAX."""
    n = p_flat.shape[0]

    # Tiny inputs: pallas_call dispatch + pipeline prologue cost more than a
    # fused XLA elementwise + reduce.
    if n < min_kernel_elems:
        return jnp.sum(jnp.abs(p_flat.astype(jnp.float32) -
                               g_flat.astype(jnp.float32)))

    itemsize = max(p_flat.dtype.itemsize, g_flat.dtype.itemsize)
    # Native sublane tile: 8 rows for 4-byte dtypes, 16 for bf16, 32 for int8.
    sub = max(8, 32 // itemsize)
    rows_total = n // LANES

    if block_rows is None:
        block_rows = TARGET_BLOCK_BYTES // (LANES * itemsize)
    block_rows = max(sub, (block_rows // sub) * sub)

    if rows_total >= block_rows:
        row_tile = block_rows
        rows_covered = rows_total            # ragged edge masked in-kernel
    else:
        row_tile = (rows_total // sub) * sub  # one full dtype-aligned block
        rows_covered = row_tile

    total = jnp.float32(0.0)
    n_in_kernel = 0

    if row_tile >= sub:
        n_lane = rows_total * LANES
        # 128-aligned element counts: free reshape, single streaming HBM read.
        # Non-aligned counts pay one prefix-slice copy of the bulk before the
        # kernel; prefer 128-aligned sizes upstream to avoid it.
        p_main = p_flat if n_lane == n else p_flat[:n_lane]
        g_main = g_flat if n_lane == n else g_flat[:n_lane]
        p2 = p_main.reshape(rows_total, LANES)
        g2 = g_main.reshape(rows_total, LANES)

        num_blocks = pl.cdiv(rows_covered, row_tile)
        if num_slices is None:
            num_slices = _tensorcore_count()
        n_par = max(1, min(int(num_slices), num_blocks))
        bpp = pl.cdiv(num_blocks, n_par)            # blocks per parallel slice
        has_phantom = n_par * bpp > num_blocks
        needs_mask = (n_par * bpp * row_tile) > rows_total

        def in_map(i, j):
            blk = i * bpp + j
            if has_phantom:
                # Keep the DMA in-bounds; the phantom block is fully masked
                # (masking uses the unclamped logical index).
                blk = jnp.minimum(blk, num_blocks - 1)
            return (blk, 0)

        kernel = functools.partial(
            _mae_partial_kernel,
            rows_total=rows_total,
            row_tile=row_tile,
            blocks_per_slice=bpp,
            needs_mask=needs_mask,
        )

        bytes_in = rows_total * LANES * (p_flat.dtype.itemsize +
                                         g_flat.dtype.itemsize)
        cost = pl.CostEstimate(
            flops=3 * rows_total * LANES,
            transcendentals=0,
            bytes_accessed=bytes_in + n_par * 8 * LANES * 4,
        )

        partials = pl.pallas_call(
            kernel,
            out_shape=jax.ShapeDtypeStruct((n_par * 8, LANES), jnp.float32),
            grid_spec=pltpu.PrefetchScalarGridSpec(
                num_scalar_prefetch=0,
                grid=(n_par, bpp),
                in_specs=[
                    pl.BlockSpec((row_tile, LANES), in_map),
                    pl.BlockSpec((row_tile, LANES), in_map),
                ],
                out_specs=pl.BlockSpec((8, LANES), lambda i, j: (i, 0)),
            ),
            compiler_params=pltpu.CompilerParams(
                dimension_semantics=("parallel", "arbitrary"),
                vmem_limit_bytes=VMEM_LIMIT_BYTES,
            ),
            cost_estimate=cost,
        )(p2, g2)

        total = jnp.sum(partials)                   # one final reduce
        n_in_kernel = rows_covered * LANES

    # Tail: at most (<sub rows)*128 + 127 elements; negligible, done in JAX.
    if n_in_kernel < n:
        tp = p_flat[n_in_kernel:].astype(jnp.float32)
        tg = g_flat[n_in_kernel:].astype(jnp.float32)
        total = total + jnp.sum(jnp.abs(tp - tg))

    return total


class GAMDLoss:
    """JAX/Pallas equivalent of the PyTorch GAMDLoss module (forward = MAE)."""

    def __init__(self, lambda_reg, verbose=False):
        self.lambda_reg = lambda_reg  # unused in forward (matches reference)
        self.verbose = verbose        # reference prints the loss; guarded here

    def __call__(self, predictions, ground_truth):
        loss = self._mae(predictions, ground_truth)
        if self.verbose:
            # jit-safe counterpart of the reference's print(loss.item()).
            jax.debug.print("Loss is:  {}", loss)
        return loss

    @staticmethod
    def _mae(predictions, ground_truth, **kwargs):
        assert predictions.shape == ground_truth.shape
        n_elems = predictions.size
        total = _abs_diff_sum(predictions.reshape(-1),
                              ground_truth.reshape(-1), **kwargs)
        return total / jnp.float32(n_elems)


if __name__ == "__main__":
    key = jax.random.PRNGKey(0)
    ks = jax.random.split(key, 8)

    loss_mod = GAMDLoss(lambda_reg=0.1)

    def ref_mae(p, g):
        return jnp.mean(jnp.abs(p.astype(jnp.float32) - g.astype(jnp.float32)))

    # 1) Module-shaped small input: batch=2, channels=4, spatial=16x16.
    #    (tiny -> pure-JAX fast path, same semantics)
    shape1 = (2, 4, 16, 16)
    p1 = jax.random.normal(ks[0], shape1, dtype=jnp.float32)
    g1 = jax.random.normal(ks[1], shape1, dtype=jnp.float32)
    l1 = loss_mod(p1, g1)
    jax.block_until_ready(l1)
    r1 = float(ref_mae(p1, g1))
    assert abs(float(l1) - r1) < 1e-5 * max(1.0, abs(r1)), (float(l1), r1)

    # 2) Pallas kernel path (128-aligned, f32, single full block).
    shape2 = (2, 4, 128, 128)
    p2 = jax.random.normal(ks[2], shape2, dtype=jnp.float32)
    g2 = jax.random.normal(ks[3], shape2, dtype=jnp.float32)
    l2 = loss_mod(p2, g2)
    jax.block_until_ready(l2)
    r2 = float(ref_mae(p2, g2))
    assert abs(float(l2) - r2) < 1e-5 * max(1.0, abs(r2)), (float(l2), r2)

    # 3) Multi-block grid + masked ragged edge + phantom slice + misaligned
    #    tail, forced through the kernel with a small test tile.
    shape3 = (2, 3, 44, 45)
    p3 = jax.random.normal(ks[4], shape3, dtype=jnp.float32)
    g3 = jax.random.normal(ks[5], shape3, dtype=jnp.float32)
    t3 = _abs_diff_sum(p3.reshape(-1), g3.reshape(-1),
                       block_rows=32, num_slices=2, min_kernel_elems=1)
    l3 = t3 / jnp.float32(p3.size)
    jax.block_until_ready(l3)
    r3 = float(ref_mae(p3, g3))
    assert abs(float(l3) - r3) < 1e-5 * max(1.0, abs(r3)), (float(l3), r3)

    # 4) bf16 inputs through the kernel (in-register upcast path).
    p4 = jax.random.normal(ks[6], shape2, dtype=jnp.float32).astype(jnp.bfloat16)
    g4 = jax.random.normal(ks[7], shape2, dtype=jnp.float32).astype(jnp.bfloat16)
    l4 = loss_mod(p4, g4)
    jax.block_until_ready(l4)
    r4 = float(ref_mae(p4, g4))
    assert abs(float(l4) - r4) < 1e-4 * max(1.0, abs(r4)), (float(l4), r4)

    print("KERNEL_OK")
</pallas_src>

<mosaic_0001>
module attributes {stable_mosaic.version = 11 : i64} {
  func.func @_mae_partial_kernel(%arg0: i32, %arg1: i32, %arg2: memref<1024x128xf32, #tpu.memory_space<vmem>>, %arg3: memref<1024x128xf32, #tpu.memory_space<vmem>>, %arg4: memref<8x128xf32, #tpu.memory_space<vmem>>) attributes {dimension_semantics = [#tpu.dimension_semantics<parallel>, #tpu.dimension_semantics<arbitrary>], iteration_bounds = array<i64: 1, 1>, scalar_prefetch = 0 : i64, scratch_operands = 0 : i64, tpu.core_type = #tpu.core_type<tc>, window_params = [{transform_indices = @transform_0, window_bounds = array<i64: 1024, 128>}, {transform_indices = @transform_1, window_bounds = array<i64: 1024, 128>}, {transform_indices = @transform_2, window_bounds = array<i64: 8, 128>}]} {
    %c0_i32 = arith.constant 0 : i32
    %0 = arith.cmpi eq, %arg1, %c0_i32 : i32
    %1 = arith.extui %0 : i1 to i32
    %c0_i32_0 = arith.constant 0 : i32
    %2 = arith.cmpi ne, %1, %c0_i32_0 : i32
    scf.if %2 {
      %cst_8 = arith.constant 0.000000e+00 : f32
      %12 = vector.broadcast %cst_8 : f32 to vector<8x128xf32>
      %c0_9 = arith.constant 0 : index
      %c0_10 = arith.constant 0 : index
      %13 = vector.load %arg4[%c0_9, %c0_10] : memref<8x128xf32, #tpu.memory_space<vmem>>, vector<8x128xf32>
      tpu.vector_store %arg4[%c0_9, %c0_10], %12 {strides = array<i32>} : memref<8x128xf32, #tpu.memory_space<vmem>>, vector<8x128xf32>,
    } else {
    }
    %c0 = arith.constant 0 : index
    %c0_1 = arith.constant 0 : index
    %3 = vector.load %arg2[%c0, %c0_1] : memref<1024x128xf32, #tpu.memory_space<vmem>>, vector<1024x128xf32>
    %c0_2 = arith.constant 0 : index
    %c0_3 = arith.constant 0 : index
    %4 = vector.load %arg3[%c0_2, %c0_3] : memref<1024x128xf32, #tpu.memory_space<vmem>>, vector<1024x128xf32>
    %5 = arith.subf %3, %4 : vector<1024x128xf32>
    %6 = math.absf %5 : vector<1024x128xf32>
    %c0_4 = arith.constant 0 : index
    %c0_5 = arith.constant 0 : index
    %7 = vector.load %arg4[%c0_4, %c0_5] : memref<8x128xf32, #tpu.memory_space<vmem>>, vector<8x128xf32>
    %8 = vector.shape_cast %6 : vector<1024x128xf32> to vector<128x8x128xf32>
    %cst = arith.constant dense<0.000000e+00> : vector<8x128xf32>
    %9 = vector.multi_reduction <add>, %8, %cst [0] : vector<128x8x128xf32> to vector<8x128xf32>
    %10 = arith.addf %7, %9 : vector<8x128xf32>
    %c0_6 = arith.constant 0 : index
    %c0_7 = arith.constant 0 : index
    %11 = vector.load %arg4[%c0_6, %c0_7] : memref<8x128xf32, #tpu.memory_space<vmem>>, vector<8x128xf32>
    tpu.vector_store %arg4[%c0_6, %c0_7], %10 {strides = array<i32>} : memref<8x128xf32, #tpu.memory_space<vmem>>, vector<8x128xf32>,
    return
  }
  func.func @transform_0(%arg0: i32, %arg1: i32) -> (i32, i32) {
    %c1_i32 = arith.constant 1 : i32
    %0 = arith.muli %arg0, %c1_i32 : i32
    %1 = arith.addi %0, %arg1 : i32
    %c0_i32 = arith.constant 0 : i32
    %c0_i32_0 = arith.constant 0 : i32
    return %1, %c0_i32 : i32, i32
  }
  func.func @transform_1(%arg0: i32, %arg1: i32) -> (i32, i32) {
    %c1_i32 = arith.constant 1 : i32
    %0 = arith.muli %arg0, %c1_i32 : i32
    %1 = arith.addi %0, %arg1 : i32
    %c0_i32 = arith.constant 0 : i32
    %c0_i32_0 = arith.constant 0 : i32
    return %1, %c0_i32 : i32, i32
  }
  func.func @transform_2(%arg0: i32, %arg1: i32) -> (i32, i32) {
    %c0_i32 = arith.constant 0 : i32
    %c0_i32_0 = arith.constant 0 : i32
    return %arg0, %c0_i32 : i32, i32
  }
}

</mosaic_0001>

<bundles_post_ra>
// kernel: tpu_custom_call.1
= control target key start
LH: loop header
LB: loop body
LE: loop exit
PB: predicated region body
PF: predicated region fallthrough
CT: control target
= control target key end

     0   :  { %7 = vsyncpa [#allocation3], 0  ;;  %s849_s0 = inlined_call_operand.hbm [shape: f32[1024,128], index: 0, kind: input, shape index: {}]   ;;  %s850_s1 = inlined_call_operand.hbm [shape: f32[1024,128], index: 1, kind: input, shape index: {}]   ;;  %s851_s2 = inlined_call_operand.hbm [shape: f32[8,128], index: 2, kind: output, shape index: {}]  }
   0x1   :  { %8 = vsyncpa [#allocation6], 0 }
   0x2   :  { %9 = vsyncpa [#allocation4], 0  ;;  %s793_s9 = smov [#allocation2]   ;;  %s721_s13 = scalar_lea.hbm %s849_s0, 16384 }
   0x3   :  { %s19_s10 = sshll.u32 %s793_s9, 4  ;;  %p722_p0 = scmp.ne.s32.totalorder %s849_s0, %s721_s13  ;;  %s20_s10 = int_to_ptr.vmem [resolvable:$true] %s19_s10 }
   0x4   :  { %p725_p1 = scmp.lt.u32.totalorder %s721_s13, %s849_s0 }
   0x6   :  { %p727_p2 = pnand %p725_p1, %p722_p0 }
   0x8   :  { %730 = shalt.err (!%p727_p2)
}
   0x9   :  { %s731_s18 = scalar_lea.vmem %s20_s10, 16384  ;;  %p736_p4 = scmp.lt.s32.totalorder %s20_s10, %s20_s10 }
   0xa   :  { %p732_p3 = scmp.ne.s32.totalorder %s20_s10, %s731_s18  ;;  %p737_p5 = scmp.lt.s32.totalorder %s731_s18, %s731_s18 }
   0xc   :  { %p738_p6 = por %p737_p5, %p736_p4 }
   0xe   :  { %p739_p7 = pnand %p738_p6, %p732_p3 }
  0x10   :  { %742 = shalt.err (!%p739_p7)
}
  0x11   :  { %s794_s19 = smov 128   ;;  %s795_s20 = smov 8  }
  0x12   :  { %25 = dma.hbm_to_vmem [thread:$0]  %s849_s0, 16384, %s20_s10, [#allocation3], %s794_s19, %s794_s19, %s795_s20  }
  0x13   :  { %s796_s23 = smov [#allocation5]   ;;  %s743_s27 = scalar_lea.hbm %s850_s1, 16384 }
  0x14   :  { %s35_s24 = sshll.u32 %s796_s23, 4  ;;  %p744_p8 = scmp.ne.s32.totalorder %s850_s1, %s743_s27  ;;  %s36_s24 = int_to_ptr.vmem [resolvable:$true] %s35_s24 }
  0x15   :  { %p747_p9 = scmp.lt.u32.totalorder %s743_s27, %s850_s1 }
  0x17   :  { %p749_p10 = pnand %p747_p9, %p744_p8 }
  0x19   :  { %752 = shalt.err (!%p749_p10)
}
  0x1a   :  { %s753_s4 = scalar_lea.vmem %s36_s24, 16384  ;;  %p758_p12 = scmp.lt.s32.totalorder %s36_s24, %s36_s24 }
  0x1b   :  { %p754_p11 = scmp.ne.s32.totalorder %s36_s24, %s753_s4  ;;  %p759_p13 = scmp.lt.s32.totalorder %s753_s4, %s753_s4 }
  0x1d   :  { %p760_p0 = por %p759_p13, %p758_p12 }
  0x1f   :  { %p761_p1 = pnand %p760_p0, %p754_p11 }
  0x21   :  { %764 = shalt.err (!%p761_p1)
}
  0x22   :  { %41 = dma.hbm_to_vmem [thread:$0]  %s850_s1, 16384, %s36_s24, [#allocation6], %s794_s19, %s794_s19, %s795_s20  }
  0x23   :  { %787 = dma.done.wait [#allocation3], 16384  }
  0x24   :  { %788 = vsyncadd [#allocation3], 4294950912 }
  0x25   :  { %789 = dma.done.wait [#allocation6], 16384  }
  0x26   :  { %790 = vsyncadd [#allocation6], 4294950912  ;;  %v57_v0 = vld [vmem:[#allocation2] sm:$0xff]  ;;  %v58_v1 = vld [vmem:[#allocation2 + $0x8] sm:$0xff]  ;;  %s797_s1 = smov [#allocation7]  }
  0x27   :  { %v185_v2 = vld [vmem:[#allocation5] sm:$0xff]  ;;  %v186_v3 = vld [vmem:[#allocation5 + $0x8] sm:$0xff]  ;;  %v59_v4 = vld [vmem:[#allocation2 + $0x10] sm:$0xff]  ;;  %s705_s6 = sshll.u32 %s797_s1, 4  ;;  %s706_s6 = int_to_ptr.vmem [resolvable:$true] %s705_s6 }
  0x28   :  { %v187_v5 = vld [vmem:[#allocation5 + $0x10] sm:$0xff]  ;;  %v313_v6 = vsub.f32 %v57_v0, %v185_v2  ;;  %v314_v7 = vsub.f32 %v58_v1, %v186_v3  ;;  %v60_v8 = vld [vmem:[#allocation2 + $0x18] sm:$0xff]  ;;  %v61_v11 = vld [vmem:[#allocation2 + $0x20] sm:$0xff]  ;;  %s765_s7 = scalar_lea.vmem %s706_s6, 128  ;;  %p770_p3 = scmp.lt.s32.totalorder %s706_s6, %s706_s6 }
  0x29   :  { %v188_v9 = vld [vmem:[#allocation5 + $0x18] sm:$0xff]  ;;  %v315_v10 = vsub.f32 %v59_v4, %v187_v5  ;;  %v189_v12 = vld [vmem:[#allocation5 + $0x20] sm:$0xff]  ;;  %v62_v16 = vld [vmem:[#allocation2 + $0x28] sm:$0xff]  ;;  %p766_p2 = scmp.ne.s32.totalorder %s706_s6, %s765_s7  ;;  %p771_p4 = scmp.lt.s32.totalorder %s765_s7, %s765_s7 }
  0x2a   :  { %v316_v13 = vsub.f32 %v60_v8, %v188_v9  ;;  %v441_v14 = vand.u32 2147483647, %v313_v6  ;;  %v442_v15 = vand.u32 2147483647, %v314_v7  ;;  %v190_v17 = vld [vmem:[#allocation5 + $0x28] sm:$0xff]  ;;  %v317_v18 = vsub.f32 %v61_v11, %v189_v12  ;;  %v63_v20 = vld [vmem:[#allocation2 + $0x30] sm:$0xff] }
  0x2b   :  { %v443_v19 = vand.u32 2147483647, %v315_v10  ;;  %v191_v21 = vld [vmem:[#allocation5 + $0x30] sm:$0xff]  ;;  %v318_v22 = vsub.f32 %v62_v16, %v190_v17  ;;  %v64_v25 = vld [vmem:[#allocation2 + $0x38] sm:$0xff]  ;;  %v65_v30 = vld [vmem:[#allocation2 + $0x40] sm:$0xff]  ;;  %p772_p5 = por %p771_p4, %p770_p3 }
  0x2c   :  { %v444_v23 = vand.u32 2147483647, %v316_v13  ;;  %v570_v24 = vadd.f32 %v442_v15, %v441_v14  ;;  %v192_v26 = vld [vmem:[#allocation5 + $0x38] sm:$0xff]  ;;  %v319_v27 = vsub.f32 %v63_v20, %v191_v21  ;;  %v445_v28 = vand.u32 2147483647, %v317_v18  ;;  %v193_v31 = vld [vmem:[#allocation5 + $0x40] sm:$0xff] }
  0x2d   :  { %v320_v32 = vsub.f32 %v64_v25, %v192_v26  ;;  %v446_v33 = vand.u32 2147483647, %v318_v22  ;;  %v66_v35 = vld [vmem:[#allocation2 + $0x48] sm:$0xff]  ;;  %v321_v37 = vsub.f32 %v65_v30, %v193_v31  ;;  %v67_v40 = vld [vmem:[#allocation2 + $0x50] sm:$0xff]  ;;  %v68_v45 = vld [vmem:[#allocation2 + $0x58] sm:$0xff]  ;;  %p773_p6 = pnand %p772_p5, %p766_p2 }
  0x2e   :  { %v571_v29 = vadd.f32 %v570_v24, %v443_v19  ;;  %v194_v36 = vld [vmem:[#allocation5 + $0x48] sm:$0xff]  ;;  %v447_v38 = vand.u32 2147483647, %v319_v27  ;;  %v195_v41 = vld [vmem:[#allocation5 + $0x50] sm:$0xff]  ;;  %v196_v46 = vld [vmem:[#allocation5 + $0x58] sm:$0xff] }
  0x2f   :  { %v322_v42 = vsub.f32 %v66_v35, %v194_v36  ;;  %v448_v43 = vand.u32 2147483647, %v320_v32  ;;  %v323_v47 = vsub.f32 %v67_v40, %v195_v41  ;;  %v449_v48 = vand.u32 2147483647, %v321_v37  ;;  %v69_v50 = vld [vmem:[#allocation2 + $0x60] sm:$0xff]  ;;  %v70_v55 = vld [vmem:[#allocation2 + $0x68] sm:$0xff] }
  0x30   :  { %v572_v34 = vadd.f32 %v571_v29, %v444_v23  ;;  %v197_v51 = vld [vmem:[#allocation5 + $0x60] sm:$0xff]  ;;  %v324_v52 = vsub.f32 %v68_v45, %v196_v46  ;;  %v198_v56 = vld [vmem:[#allocation5 + $0x68] sm:$0xff]  ;;  %v71_v60 = vld [vmem:[#allocation2 + $0x70] sm:$0xff] }
  0x31   :  { %v450_v53 = vand.u32 2147483647, %v322_v42  ;;  %v325_v57 = vsub.f32 %v69_v50, %v197_v51  ;;  %v451_v58 = vand.u32 2147483647, %v323_v47  ;;  %v199_v61 = vld [vmem:[#allocation5 + $0x70] sm:$0xff]  ;;  %v326_v62 = vsub.f32 %v70_v55, %v198_v56  ;;  %v72_v1 = vld [vmem:[#allocation2 + $0x78] sm:$0xff] }
  0x32   :  { %v573_v39 = vadd.f32 %v572_v34, %v445_v28  ;;  %v452_v63 = vand.u32 2147483647, %v324_v52  ;;  %v200_v2 = vld [vmem:[#allocation5 + $0x78] sm:$0xff]  ;;  %v327_v3 = vsub.f32 %v71_v60, %v199_v61  ;;  %v73_v6 = vld [vmem:[#allocation2 + $0x80] sm:$0xff]  ;;  %v74_v11 = vld [vmem:[#allocation2 + $0x88] sm:$0xff] }
  0x33   :  { %v453_v4 = vand.u32 2147483647, %v325_v57  ;;  %v201_v7 = vld [vmem:[#allocation5 + $0x80] sm:$0xff]  ;;  %v328_v8 = vsub.f32 %v72_v1, %v200_v2  ;;  %v454_v9 = vand.u32 2147483647, %v326_v62  ;;  %v202_v12 = vld [vmem:[#allocation5 + $0x88] sm:$0xff] }
  0x34   :  { %v574_v44 = vadd.f32 %v573_v39, %v446_v33  ;;  %v329_v13 = vsub.f32 %v73_v6, %v201_v7  ;;  %v455_v14 = vand.u32 2147483647, %v327_v3  ;;  %v75_v16 = vld [vmem:[#allocation2 + $0x90] sm:$0xff]  ;;  %v330_v18 = vsub.f32 %v74_v11, %v202_v12  ;;  %v76_v21 = vld [vmem:[#allocation2 + $0x98] sm:$0xff]  ;;  %v77_v26 = vld [vmem:[#allocation2 + $0xa0] sm:$0xff] }
  0x35   :  { %v203_v17 = vld [vmem:[#allocation5 + $0x90] sm:$0xff]  ;;  %v456_v19 = vand.u32 2147483647, %v328_v8  ;;  %v204_v22 = vld [vmem:[#allocation5 + $0x98] sm:$0xff]  ;;  %v205_v27 = vld [vmem:[#allocation5 + $0xa0] sm:$0xff] }
  0x36   :  { %v575_v49 = vadd.f32 %v574_v44, %v447_v38  ;;  %v331_v23 = vsub.f32 %v75_v16, %v203_v17  ;;  %v457_v24 = vand.u32 2147483647, %v329_v13  ;;  %v332_v28 = vsub.f32 %v76_v21, %v204_v22  ;;  %v78_v31 = vld [vmem:[#allocation2 + $0xa8] sm:$0xff]  ;;  %v79_v36 = vld [vmem:[#allocation2 + $0xb0] sm:$0xff]  ;;  %v80_v41 = vld [vmem:[#allocation2 + $0xb8] sm:$0xff] }
  0x37   :  { %v458_v29 = vand.u32 2147483647, %v330_v18  ;;  %v206_v32 = vld [vmem:[#allocation5 + $0xa8] sm:$0xff]  ;;  %v333_v33 = vsub.f32 %v77_v26, %v205_v27  ;;  %v207_v37 = vld [vmem:[#allocation5 + $0xb0] sm:$0xff]  ;;  %v208_v42 = vld [vmem:[#allocation5 + $0xb8] sm:$0xff] }
  0x38   :  { %v576_v54 = vadd.f32 %v575_v49, %v448_v43  ;;  %v459_v34 = vand.u32 2147483647, %v331_v23  ;;  %v334_v38 = vsub.f32 %v78_v31, %v206_v32  ;;  %v460_v39 = vand.u32 2147483647, %v332_v28  ;;  %v81_v46 = vld [vmem:[#allocation2 + $0xc0] sm:$0xff]  ;;  %v82_v51 = vld [vmem:[#allocation2 + $0xc8] sm:$0xff] }
  0x39   :  { %v335_v43 = vsub.f32 %v79_v36, %v207_v37  ;;  %v461_v44 = vand.u32 2147483647, %v333_v33  ;;  %v209_v47 = vld [vmem:[#allocation5 + $0xc0] sm:$0xff]  ;;  %v210_v52 = vld [vmem:[#allocation5 + $0xc8] sm:$0xff]  ;;  %v83_v56 = vld [vmem:[#allocation2 + $0xd0] sm:$0xff] }
  0x3a   :  { %v577_v59 = vadd.f32 %v576_v54, %v449_v48  ;;  %v336_v48 = vsub.f32 %v80_v41, %v208_v42  ;;  %v462_v49 = vand.u32 2147483647, %v334_v38  ;;  %v211_v57 = vld [vmem:[#allocation5 + $0xd0] sm:$0xff]  ;;  %v84_v61 = vld [vmem:[#allocation2 + $0xd8] sm:$0xff]  ;;  %v85_v2 = vld [vmem:[#allocation2 + $0xe0] sm:$0xff] }
  0x3b   :  { %v463_v54 = vand.u32 2147483647, %v335_v43  ;;  %v212_v62 = vld [vmem:[#allocation5 + $0xd8] sm:$0xff]  ;;  %v213_v3 = vld [vmem:[#allocation5 + $0xe0] sm:$0xff]  ;;  %v86_v7 = vld [vmem:[#allocation2 + $0xe8] sm:$0xff] }
  0x3c   :  { %v578_v0 = vadd.f32 %v577_v59, %v450_v53  ;;  %v337_v53 = vsub.f32 %v81_v46, %v209_v47  ;;  %v464_v59 = vand.u32 2147483647, %v336_v48  ;;  %v214_v8 = vld [vmem:[#allocation5 + $0xe8] sm:$0xff]  ;;  %v87_v12 = vld [vmem:[#allocation2 + $0xf0] sm:$0xff]  ;;  %v88_v17 = vld [vmem:[#allocation2 + $0xf8] sm:$0xff] }
  0x3d   :  { %v215_v13 = vld [vmem:[#allocation5 + $0xf0] sm:$0xff]  ;;  %v216_v18 = vld [vmem:[#allocation5 + $0xf8] sm:$0xff]  ;;  %v89_v22 = vld [vmem:[#allocation2 + $0x100] sm:$0xff] }
  0x3e   :  { %v579_v5 = vadd.f32 %v578_v0, %v451_v58  ;;  %v338_v58 = vsub.f32 %v82_v51, %v210_v52  ;;  %v465_v0 = vand.u32 2147483647, %v337_v53  ;;  %v217_v23 = vld [vmem:[#allocation5 + $0x100] sm:$0xff]  ;;  %v90_v27 = vld [vmem:[#allocation2 + $0x108] sm:$0xff]  ;;  %v91_v32 = vld [vmem:[#allocation2 + $0x110] sm:$0xff] }
  0x3f   :  { %v218_v28 = vld [vmem:[#allocation5 + $0x108] sm:$0xff]  ;;  %v219_v33 = vld [vmem:[#allocation5 + $0x110] sm:$0xff]  ;;  %v92_v37 = vld [vmem:[#allocation2 + $0x118] sm:$0xff] }
  0x40   :  { %v580_v10 = vadd.f32 %v579_v5, %v452_v63  ;;  %v339_v63 = vsub.f32 %v83_v56, %v211_v57  ;;  %v466_v5 = vand.u32 2147483647, %v338_v58  ;;  %v220_v38 = vld [vmem:[#allocation5 + $0x118] sm:$0xff]  ;;  %v93_v42 = vld [vmem:[#allocation2 + $0x120] sm:$0xff]  ;;  %v94_v47 = vld [vmem:[#allocation2 + $0x128] sm:$0xff] }
  0x41   :  { %v221_v43 = vld [vmem:[#allocation5 + $0x120] sm:$0xff]  ;;  %v222_v48 = vld [vmem:[#allocation5 + $0x128] sm:$0xff]  ;;  %v95_v52 = vld [vmem:[#allocation2 + $0x130] sm:$0xff] }
  0x42   :  { %v581_v15 = vadd.f32 %v580_v10, %v453_v4  ;;  %v340_v4 = vsub.f32 %v84_v61, %v212_v62  ;;  %v467_v10 = vand.u32 2147483647, %v339_v63  ;;  %v223_v53 = vld [vmem:[#allocation5 + $0x130] sm:$0xff]  ;;  %v96_v57 = vld [vmem:[#allocation2 + $0x138] sm:$0xff]  ;;  %v97_v62 = vld [vmem:[#allocation2 + $0x140] sm:$0xff] }
  0x43   :  { %v224_v58 = vld [vmem:[#allocation5 + $0x138] sm:$0xff]  ;;  %v225_v63 = vld [vmem:[#allocation5 + $0x140] sm:$0xff] }
  0x44   :  { %v582_v20 = vadd.f32 %v581_v15, %v454_v9  ;;  %v341_v9 = vsub.f32 %v85_v2, %v213_v3  ;;  %v468_v15 = vand.u32 2147483647, %v340_v4  ;;  %v98_v3 = vld [vmem:[#allocation2 + $0x148] sm:$0xff] }
  0x45   :  { %v226_v4 = vld [vmem:[#allocation5 + $0x148] sm:$0xff] }
  0x46   :  { %v583_v25 = vadd.f32 %v582_v20, %v455_v14  ;;  %v342_v14 = vsub.f32 %v86_v7, %v214_v8  ;;  %v469_v20 = vand.u32 2147483647, %v341_v9  ;;  %v99_v8 = vld [vmem:[#allocation2 + $0x150] sm:$0xff] }
  0x47   :  { %v227_v9 = vld [vmem:[#allocation5 + $0x150] sm:$0xff] }
  0x48   :  { %v584_v30 = vadd.f32 %v583_v25, %v456_v19  ;;  %v343_v19 = vsub.f32 %v87_v12, %v215_v13  ;;  %v470_v25 = vand.u32 2147483647, %v342_v14  ;;  %v100_v13 = vld [vmem:[#allocation2 + $0x158] sm:$0xff] }
  0x49   :  { %v228_v14 = vld [vmem:[#allocation5 + $0x158] sm:$0xff] }
  0x4a   :  { %v585_v35 = vadd.f32 %v584_v30, %v457_v24  ;;  %v344_v24 = vsub.f32 %v88_v17, %v216_v18  ;;  %v471_v30 = vand.u32 2147483647, %v343_v19  ;;  %v101_v18 = vld [vmem:[#allocation2 + $0x160] sm:$0xff] }
  0x4b   :  { %v229_v19 = vld [vmem:[#allocation5 + $0x160] sm:$0xff] }
  0x4c   :  { %v586_v40 = vadd.f32 %v585_v35, %v458_v29  ;;  %v345_v29 = vsub.f32 %v89_v22, %v217_v23  ;;  %v472_v35 = vand.u32 2147483647, %v344_v24  ;;  %v102_v23 = vld [vmem:[#allocation2 + $0x168] sm:$0xff] }
  0x4d   :  { %v230_v24 = vld [vmem:[#allocation5 + $0x168] sm:$0xff] }
  0x4e   :  { %v587_v45 = vadd.f32 %v586_v40, %v459_v34  ;;  %v346_v34 = vsub.f32 %v90_v27, %v218_v28  ;;  %v473_v40 = vand.u32 2147483647, %v345_v29  ;;  %v103_v28 = vld [vmem:[#allocation2 + $0x170] sm:$0xff] }
  0x4f   :  { %v231_v29 = vld [vmem:[#allocation5 + $0x170] sm:$0xff] }
  0x50   :  { %v588_v50 = vadd.f32 %v587_v45, %v460_v39  ;;  %v347_v39 = vsub.f32 %v91_v32, %v219_v33  ;;  %v474_v45 = vand.u32 2147483647, %v346_v34  ;;  %v104_v33 = vld [vmem:[#allocation2 + $0x178] sm:$0xff] }
  0x51   :  { %v232_v34 = vld [vmem:[#allocation5 + $0x178] sm:$0xff] }
  0x52   :  { %v589_v55 = vadd.f32 %v588_v50, %v461_v44  ;;  %v348_v44 = vsub.f32 %v92_v37, %v220_v38  ;;  %v475_v50 = vand.u32 2147483647, %v347_v39  ;;  %v105_v38 = vld [vmem:[#allocation2 + $0x180] sm:$0xff] }
  0x53   :  { %v233_v39 = vld [vmem:[#allocation5 + $0x180] sm:$0xff] }
  0x54   :  { %v590_v60 = vadd.f32 %v589_v55, %v462_v49  ;;  %v349_v49 = vsub.f32 %v93_v42, %v221_v43  ;;  %v476_v55 = vand.u32 2147483647, %v348_v44  ;;  %v106_v43 = vld [vmem:[#allocation2 + $0x188] sm:$0xff] }
  0x55   :  { %v234_v44 = vld [vmem:[#allocation5 + $0x188] sm:$0xff] }
  0x56   :  { %v591_v1 = vadd.f32 %v590_v60, %v463_v54  ;;  %v350_v54 = vsub.f32 %v94_v47, %v222_v48  ;;  %v477_v60 = vand.u32 2147483647, %v349_v49  ;;  %v107_v48 = vld [vmem:[#allocation2 + $0x190] sm:$0xff] }
  0x57   :  { %v235_v49 = vld [vmem:[#allocation5 + $0x190] sm:$0xff] }
  0x58   :  { %v592_v6 = vadd.f32 %v591_v1, %v464_v59  ;;  %v351_v59 = vsub.f32 %v95_v52, %v223_v53  ;;  %v478_v1 = vand.u32 2147483647, %v350_v54  ;;  %v108_v53 = vld [vmem:[#allocation2 + $0x198] sm:$0xff] }
  0x59   :  { %v236_v54 = vld [vmem:[#allocation5 + $0x198] sm:$0xff] }
  0x5a   :  { %v593_v11 = vadd.f32 %v592_v6, %v465_v0  ;;  %v352_v0 = vsub.f32 %v96_v57, %v224_v58  ;;  %v479_v6 = vand.u32 2147483647, %v351_v59  ;;  %v109_v58 = vld [vmem:[#allocation2 + $0x1a0] sm:$0xff] }
  0x5b   :  { %v237_v59 = vld [vmem:[#allocation5 + $0x1a0] sm:$0xff] }
  0x5c   :  { %v594_v16 = vadd.f32 %v593_v11, %v466_v5  ;;  %v353_v5 = vsub.f32 %v97_v62, %v225_v63  ;;  %v480_v11 = vand.u32 2147483647, %v352_v0  ;;  %v110_v63 = vld [vmem:[#allocation2 + $0x1a8] sm:$0xff] }
  0x5d   :  { %v238_v0 = vld [vmem:[#allocation5 + $0x1a8] sm:$0xff] }
  0x5e   :  { %v595_v21 = vadd.f32 %v594_v16, %v467_v10  ;;  %v354_v10 = vsub.f32 %v98_v3, %v226_v4  ;;  %v481_v16 = vand.u32 2147483647, %v353_v5  ;;  %v111_v4 = vld [vmem:[#allocation2 + $0x1b0] sm:$0xff] }
  0x5f   :  { %v239_v5 = vld [vmem:[#allocation5 + $0x1b0] sm:$0xff] }
  0x60   :  { %v596_v26 = vadd.f32 %v595_v21, %v468_v15  ;;  %v355_v15 = vsub.f32 %v99_v8, %v227_v9  ;;  %v482_v21 = vand.u32 2147483647, %v354_v10  ;;  %v112_v9 = vld [vmem:[#allocation2 + $0x1b8] sm:$0xff] }
  0x61   :  { %v240_v10 = vld [vmem:[#allocation5 + $0x1b8] sm:$0xff] }
  0x62   :  { %v597_v31 = vadd.f32 %v596_v26, %v469_v20  ;;  %v356_v20 = vsub.f32 %v100_v13, %v228_v14  ;;  %v483_v26 = vand.u32 2147483647, %v355_v15  ;;  %v113_v14 = vld [vmem:[#allocation2 + $0x1c0] sm:$0xff] }
  0x63   :  { %v241_v15 = vld [vmem:[#allocation5 + $0x1c0] sm:$0xff] }
  0x64   :  { %v598_v36 = vadd.f32 %v597_v31, %v470_v25  ;;  %v357_v25 = vsub.f32 %v101_v18, %v229_v19  ;;  %v484_v31 = vand.u32 2147483647, %v356_v20  ;;  %v114_v19 = vld [vmem:[#allocation2 + $0x1c8] sm:$0xff] }
  0x65   :  { %v242_v20 = vld [vmem:[#allocation5 + $0x1c8] sm:$0xff] }
  0x66   :  { %v599_v41 = vadd.f32 %v598_v36, %v471_v30  ;;  %v358_v30 = vsub.f32 %v102_v23, %v230_v24  ;;  %v485_v36 = vand.u32 2147483647, %v357_v25  ;;  %v115_v24 = vld [vmem:[#allocation2 + $0x1d0] sm:$0xff] }
  0x67   :  { %v243_v25 = vld [vmem:[#allocation5 + $0x1d0] sm:$0xff] }
  0x68   :  { %v600_v46 = vadd.f32 %v599_v41, %v472_v35  ;;  %v359_v35 = vsub.f32 %v103_v28, %v231_v29  ;;  %v486_v41 = vand.u32 2147483647, %v358_v30  ;;  %v116_v29 = vld [vmem:[#allocation2 + $0x1d8] sm:$0xff] }
  0x69   :  { %v244_v30 = vld [vmem:[#allocation5 + $0x1d8] sm:$0xff] }
  0x6a   :  { %v601_v51 = vadd.f32 %v600_v46, %v473_v40  ;;  %v360_v40 = vsub.f32 %v104_v33, %v232_v34  ;;  %v487_v46 = vand.u32 2147483647, %v359_v35  ;;  %v117_v34 = vld [vmem:[#allocation2 + $0x1e0] sm:$0xff] }
  0x6b   :  { %v245_v35 = vld [vmem:[#allocation5 + $0x1e0] sm:$0xff] }
  0x6c   :  { %v602_v56 = vadd.f32 %v601_v51, %v474_v45  ;;  %v361_v45 = vsub.f32 %v105_v38, %v233_v39  ;;  %v488_v51 = vand.u32 2147483647, %v360_v40  ;;  %v118_v39 = vld [vmem:[#allocation2 + $0x1e8] sm:$0xff] }
  0x6d   :  { %v246_v40 = vld [vmem:[#allocation5 + $0x1e8] sm:$0xff] }
  0x6e   :  { %v603_v61 = vadd.f32 %v602_v56, %v475_v50  ;;  %v362_v50 = vsub.f32 %v106_v43, %v234_v44  ;;  %v489_v56 = vand.u32 2147483647, %v361_v45  ;;  %v119_v44 = vld [vmem:[#allocation2 + $0x1f0] sm:$0xff] }
  0x6f   :  { %v247_v45 = vld [vmem:[#allocation5 + $0x1f0] sm:$0xff] }
  0x70   :  { %v604_v2 = vadd.f32 %v603_v61, %v476_v55  ;;  %v363_v55 = vsub.f32 %v107_v48, %v235_v49  ;;  %v490_v61 = vand.u32 2147483647, %v362_v50  ;;  %v120_v49 = vld [vmem:[#allocation2 + $0x1f8] sm:$0xff] }
  0x71   :  { %v248_v50 = vld [vmem:[#allocation5 + $0x1f8] sm:$0xff] }
  0x72   :  { %v605_v7 = vadd.f32 %v604_v2, %v477_v60  ;;  %v364_v60 = vsub.f32 %v108_v53, %v236_v54  ;;  %v491_v2 = vand.u32 2147483647, %v363_v55  ;;  %v121_v54 = vld [vmem:[#allocation2 + $0x200] sm:$0xff] }
  0x73   :  { %v249_v55 = vld [vmem:[#allocation5 + $0x200] sm:$0xff] }
  0x74   :  { %v606_v12 = vadd.f32 %v605_v7, %v478_v1  ;;  %v365_v1 = vsub.f32 %v109_v58, %v237_v59  ;;  %v492_v7 = vand.u32 2147483647, %v364_v60  ;;  %v122_v59 = vld [vmem:[#allocation2 + $0x208] sm:$0xff] }
  0x75   :  { %v250_v60 = vld [vmem:[#allocation5 + $0x208] sm:$0xff] }
  0x76   :  { %v607_v17 = vadd.f32 %v606_v12, %v479_v6  ;;  %v366_v6 = vsub.f32 %v110_v63, %v238_v0  ;;  %v493_v12 = vand.u32 2147483647, %v365_v1  ;;  %v123_v0 = vld [vmem:[#allocation2 + $0x210] sm:$0xff] }
  0x77   :  { %v251_v1 = vld [vmem:[#allocation5 + $0x210] sm:$0xff] }
  0x78   :  { %v608_v22 = vadd.f32 %v607_v17, %v480_v11  ;;  %v367_v11 = vsub.f32 %v111_v4, %v239_v5  ;;  %v494_v17 = vand.u32 2147483647, %v366_v6  ;;  %v124_v5 = vld [vmem:[#allocation2 + $0x218] sm:$0xff] }
  0x79   :  { %v252_v6 = vld [vmem:[#allocation5 + $0x218] sm:$0xff] }
  0x7a   :  { %v609_v27 = vadd.f32 %v608_v22, %v481_v16  ;;  %v368_v16 = vsub.f32 %v112_v9, %v240_v10  ;;  %v495_v22 = vand.u32 2147483647, %v367_v11  ;;  %v125_v10 = vld [vmem:[#allocation2 + $0x220] sm:$0xff] }
  0x7b   :  { %v253_v11 = vld [vmem:[#allocation5 + $0x220] sm:$0xff] }
  0x7c   :  { %v610_v32 = vadd.f32 %v609_v27, %v482_v21  ;;  %v369_v21 = vsub.f32 %v113_v14, %v241_v15  ;;  %v496_v27 = vand.u32 2147483647, %v368_v16  ;;  %v126_v15 = vld [vmem:[#allocation2 + $0x228] sm:$0xff] }
  0x7d   :  { %v254_v16 = vld [vmem:[#allocation5 + $0x228] sm:$0xff] }
  0x7e   :  { %v611_v37 = vadd.f32 %v610_v32, %v483_v26  ;;  %v370_v26 = vsub.f32 %v114_v19, %v242_v20  ;;  %v497_v32 = vand.u32 2147483647, %v369_v21  ;;  %v127_v20 = vld [vmem:[#allocation2 + $0x230] sm:$0xff] }
  0x7f   :  { %v255_v21 = vld [vmem:[#allocation5 + $0x230] sm:$0xff] }
  0x80   :  { %v612_v42 = vadd.f32 %v611_v37, %v484_v31  ;;  %v371_v31 = vsub.f32 %v115_v24, %v243_v25  ;;  %v498_v37 = vand.u32 2147483647, %v370_v26  ;;  %v128_v25 = vld [vmem:[#allocation2 + $0x238] sm:$0xff] }
  0x81   :  { %v256_v26 = vld [vmem:[#allocation5 + $0x238] sm:$0xff] }
  0x82   :  { %v613_v47 = vadd.f32 %v612_v42, %v485_v36  ;;  %v372_v36 = vsub.f32 %v116_v29, %v244_v30  ;;  %v499_v42 = vand.u32 2147483647, %v371_v31  ;;  %v129_v30 = vld [vmem:[#allocation2 + $0x240] sm:$0xff] }
  0x83   :  { %v257_v31 = vld [vmem:[#allocation5 + $0x240] sm:$0xff] }
  0x84   :  { %v614_v52 = vadd.f32 %v613_v47, %v486_v41  ;;  %v373_v41 = vsub.f32 %v117_v34, %v245_v35  ;;  %v500_v47 = vand.u32 2147483647, %v372_v36  ;;  %v130_v35 = vld [vmem:[#allocation2 + $0x248] sm:$0xff] }
  0x85   :  { %v258_v36 = vld [vmem:[#allocation5 + $0x248] sm:$0xff] }
  0x86   :  { %v615_v57 = vadd.f32 %v614_v52, %v487_v46  ;;  %v374_v46 = vsub.f32 %v118_v39, %v246_v40  ;;  %v501_v52 = vand.u32 2147483647, %v373_v41  ;;  %v131_v40 = vld [vmem:[#allocation2 + $0x250] sm:$0xff] }
  0x87   :  { %v259_v41 = vld [vmem:[#allocation5 + $0x250] sm:$0xff] }
  0x88   :  { %v616_v62 = vadd.f32 %v615_v57, %v488_v51  ;;  %v375_v51 = vsub.f32 %v119_v44, %v247_v45  ;;  %v502_v57 = vand.u32 2147483647, %v374_v46  ;;  %v132_v45 = vld [vmem:[#allocation2 + $0x258] sm:$0xff] }
  0x89   :  { %v260_v46 = vld [vmem:[#allocation5 + $0x258] sm:$0xff] }
  0x8a   :  { %v617_v3 = vadd.f32 %v616_v62, %v489_v56  ;;  %v376_v56 = vsub.f32 %v120_v49, %v248_v50  ;;  %v503_v62 = vand.u32 2147483647, %v375_v51  ;;  %v133_v50 = vld [vmem:[#allocation2 + $0x260] sm:$0xff] }
  0x8b   :  { %v261_v51 = vld [vmem:[#allocation5 + $0x260] sm:$0xff] }
  0x8c   :  { %v618_v8 = vadd.f32 %v617_v3, %v490_v61  ;;  %v377_v61 = vsub.f32 %v121_v54, %v249_v55  ;;  %v504_v3 = vand.u32 2147483647, %v376_v56  ;;  %v134_v55 = vld [vmem:[#allocation2 + $0x268] sm:$0xff] }
  0x8d   :  { %v262_v56 = vld [vmem:[#allocation5 + $0x268] sm:$0xff] }
  0x8e   :  { %v619_v13 = vadd.f32 %v618_v8, %v491_v2  ;;  %v378_v2 = vsub.f32 %v122_v59, %v250_v60  ;;  %v505_v8 = vand.u32 2147483647, %v377_v61  ;;  %v135_v60 = vld [vmem:[#allocation2 + $0x270] sm:$0xff] }
  0x8f   :  { %v263_v61 = vld [vmem:[#allocation5 + $0x270] sm:$0xff] }
  0x90   :  { %v620_v18 = vadd.f32 %v619_v13, %v492_v7  ;;  %v379_v7 = vsub.f32 %v123_v0, %v251_v1  ;;  %v506_v13 = vand.u32 2147483647, %v378_v2  ;;  %v136_v1 = vld [vmem:[#allocation2 + $0x278] sm:$0xff] }
  0x91   :  { %v264_v2 = vld [vmem:[#allocation5 + $0x278] sm:$0xff] }
  0x92   :  { %v621_v23 = vadd.f32 %v620_v18, %v493_v12  ;;  %v380_v12 = vsub.f32 %v124_v5, %v252_v6  ;;  %v507_v18 = vand.u32 2147483647, %v379_v7  ;;  %v137_v6 = vld [vmem:[#allocation2 + $0x280] sm:$0xff] }
  0x93   :  { %v265_v7 = vld [vmem:[#allocation5 + $0x280] sm:$0xff] }
  0x94   :  { %v622_v28 = vadd.f32 %v621_v23, %v494_v17  ;;  %v381_v17 = vsub.f32 %v125_v10, %v253_v11  ;;  %v508_v23 = vand.u32 2147483647, %v380_v12  ;;  %v138_v11 = vld [vmem:[#allocation2 + $0x288] sm:$0xff] }
  0x95   :  { %v266_v12 = vld [vmem:[#allocation5 + $0x288] sm:$0xff] }
  0x96   :  { %v623_v33 = vadd.f32 %v622_v28, %v495_v22  ;;  %v382_v22 = vsub.f32 %v126_v15, %v254_v16  ;;  %v509_v28 = vand.u32 2147483647, %v381_v17  ;;  %v139_v16 = vld [vmem:[#allocation2 + $0x290] sm:$0xff] }
  0x97   :  { %v267_v17 = vld [vmem:[#allocation5 + $0x290] sm:$0xff] }
  0x98   :  { %v624_v38 = vadd.f32 %v623_v33, %v496_v27  ;;  %v383_v27 = vsub.f32 %v127_v20, %v255_v21  ;;  %v510_v33 = vand.u32 2147483647, %v382_v22  ;;  %v140_v21 = vld [vmem:[#allocation2 + $0x298] sm:$0xff] }
  0x99   :  { %v268_v22 = vld [vmem:[#allocation5 + $0x298] sm:$0xff] }
  0x9a   :  { %v625_v43 = vadd.f32 %v624_v38, %v497_v32  ;;  %v384_v32 = vsub.f32 %v128_v25, %v256_v26  ;;  %v511_v38 = vand.u32 2147483647, %v383_v27  ;;  %v141_v26 = vld [vmem:[#allocation2 + $0x2a0] sm:$0xff] }
  0x9b   :  { %v269_v27 = vld [vmem:[#allocation5 + $0x2a0] sm:$0xff] }
  0x9c   :  { %v626_v48 = vadd.f32 %v625_v43, %v498_v37  ;;  %v385_v37 = vsub.f32 %v129_v30, %v257_v31  ;;  %v512_v43 = vand.u32 2147483647, %v384_v32  ;;  %v142_v31 = vld [vmem:[#allocation2 + $0x2a8] sm:$0xff] }
  0x9d   :  { %v270_v32 = vld [vmem:[#allocation5 + $0x2a8] sm:$0xff] }
  0x9e   :  { %v627_v53 = vadd.f32 %v626_v48, %v499_v42  ;;  %v386_v42 = vsub.f32 %v130_v35, %v258_v36  ;;  %v513_v48 = vand.u32 2147483647, %v385_v37  ;;  %v143_v36 = vld [vmem:[#allocation2 + $0x2b0] sm:$0xff] }
  0x9f   :  { %v271_v37 = vld [vmem:[#allocation5 + $0x2b0] sm:$0xff] }
  0xa0   :  { %v628_v58 = vadd.f32 %v627_v53, %v500_v47  ;;  %v387_v47 = vsub.f32 %v131_v40, %v259_v41  ;;  %v514_v53 = vand.u32 2147483647, %v386_v42  ;;  %v144_v41 = vld [vmem:[#allocation2 + $0x2b8] sm:$0xff] }
  0xa1   :  { %v272_v42 = vld [vmem:[#allocation5 + $0x2b8] sm:$0xff] }
  0xa2   :  { %v629_v63 = vadd.f32 %v628_v58, %v501_v52  ;;  %v388_v52 = vsub.f32 %v132_v45, %v260_v46  ;;  %v515_v58 = vand.u32 2147483647, %v387_v47  ;;  %v145_v46 = vld [vmem:[#allocation2 + $0x2c0] sm:$0xff] }
  0xa3   :  { %v273_v47 = vld [vmem:[#allocation5 + $0x2c0] sm:$0xff] }
  0xa4   :  { %v630_v4 = vadd.f32 %v629_v63, %v502_v57  ;;  %v389_v57 = vsub.f32 %v133_v50, %v261_v51  ;;  %v516_v63 = vand.u32 2147483647, %v388_v52  ;;  %v146_v51 = vld [vmem:[#allocation2 + $0x2c8] sm:$0xff] }
  0xa5   :  { %v274_v52 = vld [vmem:[#allocation5 + $0x2c8] sm:$0xff] }
  0xa6   :  { %v631_v9 = vadd.f32 %v630_v4, %v503_v62  ;;  %v390_v62 = vsub.f32 %v134_v55, %v262_v56  ;;  %v517_v4 = vand.u32 2147483647, %v389_v57  ;;  %v147_v56 = vld [vmem:[#allocation2 + $0x2d0] sm:$0xff] }
  0xa7   :  { %v275_v57 = vld [vmem:[#allocation5 + $0x2d0] sm:$0xff] }
  0xa8   :  { %v632_v14 = vadd.f32 %v631_v9, %v504_v3  ;;  %v391_v3 = vsub.f32 %v135_v60, %v263_v61  ;;  %v518_v9 = vand.u32 2147483647, %v390_v62  ;;  %v148_v61 = vld [vmem:[#allocation2 + $0x2d8] sm:$0xff] }
  0xa9   :  { %v276_v62 = vld [vmem:[#allocation5 + $0x2d8] sm:$0xff] }
  0xaa   :  { %v633_v19 = vadd.f32 %v632_v14, %v505_v8  ;;  %v392_v8 = vsub.f32 %v136_v1, %v264_v2  ;;  %v519_v14 = vand.u32 2147483647, %v391_v3  ;;  %v149_v2 = vld [vmem:[#allocation2 + $0x2e0] sm:$0xff] }
  0xab   :  { %v277_v3 = vld [vmem:[#allocation5 + $0x2e0] sm:$0xff] }
  0xac   :  { %v634_v24 = vadd.f32 %v633_v19, %v506_v13  ;;  %v393_v13 = vsub.f32 %v137_v6, %v265_v7  ;;  %v520_v19 = vand.u32 2147483647, %v392_v8  ;;  %v150_v7 = vld [vmem:[#allocation2 + $0x2e8] sm:$0xff] }
  0xad   :  { %v278_v8 = vld [vmem:[#allocation5 + $0x2e8] sm:$0xff] }
  0xae   :  { %v635_v29 = vadd.f32 %v634_v24, %v507_v18  ;;  %v394_v18 = vsub.f32 %v138_v11, %v266_v12  ;;  %v521_v24 = vand.u32 2147483647, %v393_v13  ;;  %v151_v12 = vld [vmem:[#allocation2 + $0x2f0] sm:$0xff] }
  0xaf   :  { %v279_v13 = vld [vmem:[#allocation5 + $0x2f0] sm:$0xff] }
  0xb0   :  { %v636_v34 = vadd.f32 %v635_v29, %v508_v23  ;;  %v395_v23 = vsub.f32 %v139_v16, %v267_v17  ;;  %v522_v29 = vand.u32 2147483647, %v394_v18  ;;  %v152_v17 = vld [vmem:[#allocation2 + $0x2f8] sm:$0xff] }
  0xb1   :  { %v280_v18 = vld [vmem:[#allocation5 + $0x2f8] sm:$0xff] }
  0xb2   :  { %v637_v39 = vadd.f32 %v636_v34, %v509_v28  ;;  %v396_v28 = vsub.f32 %v140_v21, %v268_v22  ;;  %v523_v34 = vand.u32 2147483647, %v395_v23  ;;  %v153_v22 = vld [vmem:[#allocation2 + $0x300] sm:$0xff] }
  0xb3   :  { %v281_v23 = vld [vmem:[#allocation5 + $0x300] sm:$0xff] }
  0xb4   :  { %v638_v44 = vadd.f32 %v637_v39, %v510_v33  ;;  %v397_v33 = vsub.f32 %v141_v26, %v269_v27  ;;  %v524_v39 = vand.u32 2147483647, %v396_v28  ;;  %v154_v27 = vld [vmem:[#allocation2 + $0x308] sm:$0xff] }
  0xb5   :  { %v282_v28 = vld [vmem:[#allocation5 + $0x308] sm:$0xff] }
  0xb6   :  { %v639_v49 = vadd.f32 %v638_v44, %v511_v38  ;;  %v398_v38 = vsub.f32 %v142_v31, %v270_v32  ;;  %v525_v44 = vand.u32 2147483647, %v397_v33  ;;  %v155_v32 = vld [vmem:[#allocation2 + $0x310] sm:$0xff] }
  0xb7   :  { %v283_v33 = vld [vmem:[#allocation5 + $0x310] sm:$0xff] }
  0xb8   :  { %v640_v54 = vadd.f32 %v639_v49, %v512_v43  ;;  %v399_v43 = vsub.f32 %v143_v36, %v271_v37  ;;  %v526_v49 = vand.u32 2147483647, %v398_v38  ;;  %v156_v37 = vld [vmem:[#allocation2 + $0x318] sm:$0xff] }
  0xb9   :  { %v284_v38 = vld [vmem:[#allocation5 + $0x318] sm:$0xff] }
  0xba   :  { %v641_v59 = vadd.f32 %v640_v54, %v513_v48  ;;  %v400_v48 = vsub.f32 %v144_v41, %v272_v42  ;;  %v527_v54 = vand.u32 2147483647, %v399_v43  ;;  %v157_v42 = vld [vmem:[#allocation2 + $0x320] sm:$0xff] }
  0xbb   :  { %v285_v43 = vld [vmem:[#allocation5 + $0x320] sm:$0xff] }
  0xbc   :  { %v642_v0 = vadd.f32 %v641_v59, %v514_v53  ;;  %v401_v53 = vsub.f32 %v145_v46, %v273_v47  ;;  %v528_v59 = vand.u32 2147483647, %v400_v48  ;;  %v158_v47 = vld [vmem:[#allocation2 + $0x328] sm:$0xff] }
  0xbd   :  { %v286_v48 = vld [vmem:[#allocation5 + $0x328] sm:$0xff] }
  0xbe   :  { %v643_v5 = vadd.f32 %v642_v0, %v515_v58  ;;  %v402_v58 = vsub.f32 %v146_v51, %v274_v52  ;;  %v529_v0 = vand.u32 2147483647, %v401_v53  ;;  %v159_v52 = vld [vmem:[#allocation2 + $0x330] sm:$0xff] }
  0xbf   :  { %v287_v53 = vld [vmem:[#allocation5 + $0x330] sm:$0xff] }
  0xc0   :  { %v644_v10 = vadd.f32 %v643_v5, %v516_v63  ;;  %v403_v63 = vsub.f32 %v147_v56, %v275_v57  ;;  %v530_v5 = vand.u32 2147483647, %v402_v58  ;;  %v160_v57 = vld [vmem:[#allocation2 + $0x338] sm:$0xff] }
  0xc1   :  { %v288_v58 = vld [vmem:[#allocation5 + $0x338] sm:$0xff] }
  0xc2   :  { %v645_v15 = vadd.f32 %v644_v10, %v517_v4  ;;  %v404_v4 = vsub.f32 %v148_v61, %v276_v62  ;;  %v531_v10 = vand.u32 2147483647, %v403_v63  ;;  %v161_v62 = vld [vmem:[#allocation2 + $0x340] sm:$0xff] }
  0xc3   :  { %v289_v63 = vld [vmem:[#allocation5 + $0x340] sm:$0xff] }
  0xc4   :  { %v646_v20 = vadd.f32 %v645_v15, %v518_v9  ;;  %v405_v9 = vsub.f32 %v149_v2, %v277_v3  ;;  %v532_v15 = vand.u32 2147483647, %v404_v4  ;;  %v162_v3 = vld [vmem:[#allocation2 + $0x348] sm:$0xff] }
  0xc5   :  { %v290_v4 = vld [vmem:[#allocation5 + $0x348] sm:$0xff] }
  0xc6   :  { %v647_v25 = vadd.f32 %v646_v20, %v519_v14  ;;  %v406_v14 = vsub.f32 %v150_v7, %v278_v8  ;;  %v533_v20 = vand.u32 2147483647, %v405_v9  ;;  %v163_v8 = vld [vmem:[#allocation2 + $0x350] sm:$0xff] }
  0xc7   :  { %v291_v9 = vld [vmem:[#allocation5 + $0x350] sm:$0xff] }
  0xc8   :  { %v648_v30 = vadd.f32 %v647_v25, %v520_v19  ;;  %v407_v19 = vsub.f32 %v151_v12, %v279_v13  ;;  %v534_v25 = vand.u32 2147483647, %v406_v14  ;;  %v164_v13 = vld [vmem:[#allocation2 + $0x358] sm:$0xff] }
  0xc9   :  { %v292_v14 = vld [vmem:[#allocation5 + $0x358] sm:$0xff] }
  0xca   :  { %v649_v35 = vadd.f32 %v648_v30, %v521_v24  ;;  %v408_v24 = vsub.f32 %v152_v17, %v280_v18  ;;  %v535_v30 = vand.u32 2147483647, %v407_v19  ;;  %v165_v18 = vld [vmem:[#allocation2 + $0x360] sm:$0xff] }
  0xcb   :  { %v293_v19 = vld [vmem:[#allocation5 + $0x360] sm:$0xff] }
  0xcc   :  { %v650_v40 = vadd.f32 %v649_v35, %v522_v29  ;;  %v409_v29 = vsub.f32 %v153_v22, %v281_v23  ;;  %v536_v35 = vand.u32 2147483647, %v408_v24  ;;  %v166_v23 = vld [vmem:[#allocation2 + $0x368] sm:$0xff] }
  0xcd   :  { %v294_v24 = vld [vmem:[#allocation5 + $0x368] sm:$0xff] }
  0xce   :  { %v651_v45 = vadd.f32 %v650_v40, %v523_v34  ;;  %v410_v34 = vsub.f32 %v154_v27, %v282_v28  ;;  %v537_v40 = vand.u32 2147483647, %v409_v29  ;;  %v167_v28 = vld [vmem:[#allocation2 + $0x370] sm:$0xff] }
  0xcf   :  { %v295_v29 = vld [vmem:[#allocation5 + $0x370] sm:$0xff] }
  0xd0   :  { %v652_v50 = vadd.f32 %v651_v45, %v524_v39  ;;  %v411_v39 = vsub.f32 %v155_v32, %v283_v33  ;;  %v538_v45 = vand.u32 2147483647, %v410_v34  ;;  %v168_v33 = vld [vmem:[#allocation2 + $0x378] sm:$0xff] }
  0xd1   :  { %v296_v34 = vld [vmem:[#allocation5 + $0x378] sm:$0xff] }
  0xd2   :  { %v653_v55 = vadd.f32 %v652_v50, %v525_v44  ;;  %v412_v44 = vsub.f32 %v156_v37, %v284_v38  ;;  %v539_v50 = vand.u32 2147483647, %v411_v39  ;;  %v169_v38 = vld [vmem:[#allocation2 + $0x380] sm:$0xff] }
  0xd3   :  { %v297_v39 = vld [vmem:[#allocation5 + $0x380] sm:$0xff] }
  0xd4   :  { %v654_v60 = vadd.f32 %v653_v55, %v526_v49  ;;  %v413_v49 = vsub.f32 %v157_v42, %v285_v43  ;;  %v540_v55 = vand.u32 2147483647, %v412_v44  ;;  %v170_v43 = vld [vmem:[#allocation2 + $0x388] sm:$0xff] }
  0xd5   :  { %v298_v44 = vld [vmem:[#allocation5 + $0x388] sm:$0xff] }
  0xd6   :  { %v655_v1 = vadd.f32 %v654_v60, %v527_v54  ;;  %v414_v54 = vsub.f32 %v158_v47, %v286_v48  ;;  %v541_v60 = vand.u32 2147483647, %v413_v49  ;;  %v171_v48 = vld [vmem:[#allocation2 + $0x390] sm:$0xff] }
  0xd7   :  { %v299_v49 = vld [vmem:[#allocation5 + $0x390] sm:$0xff] }
  0xd8   :  { %v656_v6 = vadd.f32 %v655_v1, %v528_v59  ;;  %v415_v59 = vsub.f32 %v159_v52, %v287_v53  ;;  %v542_v1 = vand.u32 2147483647, %v414_v54  ;;  %v172_v53 = vld [vmem:[#allocation2 + $0x398] sm:$0xff] }
  0xd9   :  { %v300_v54 = vld [vmem:[#allocation5 + $0x398] sm:$0xff] }
  0xda   :  { %v657_v11 = vadd.f32 %v656_v6, %v529_v0  ;;  %v416_v0 = vsub.f32 %v160_v57, %v288_v58  ;;  %v543_v6 = vand.u32 2147483647, %v415_v59  ;;  %v173_v58 = vld [vmem:[#allocation2 + $0x3a0] sm:$0xff] }
  0xdb   :  { %v301_v59 = vld [vmem:[#allocation5 + $0x3a0] sm:$0xff] }
  0xdc   :  { %v658_v16 = vadd.f32 %v657_v11, %v530_v5  ;;  %v417_v5 = vsub.f32 %v161_v62, %v289_v63  ;;  %v544_v11 = vand.u32 2147483647, %v416_v0  ;;  %v174_v63 = vld [vmem:[#allocation2 + $0x3a8] sm:$0xff] }
  0xdd   :  { %v302_v0 = vld [vmem:[#allocation5 + $0x3a8] sm:$0xff] }
  0xde   :  { %v659_v21 = vadd.f32 %v658_v16, %v531_v10  ;;  %v418_v10 = vsub.f32 %v162_v3, %v290_v4  ;;  %v545_v16 = vand.u32 2147483647, %v417_v5  ;;  %v175_v4 = vld [vmem:[#allocation2 + $0x3b0] sm:$0xff] }
  0xdf   :  { %v303_v5 = vld [vmem:[#allocation5 + $0x3b0] sm:$0xff] }
  0xe0   :  { %v660_v26 = vadd.f32 %v659_v21, %v532_v15  ;;  %v419_v15 = vsub.f32 %v163_v8, %v291_v9  ;;  %v546_v21 = vand.u32 2147483647, %v418_v10  ;;  %v176_v9 = vld [vmem:[#allocation2 + $0x3b8] sm:$0xff] }
  0xe1   :  { %v304_v10 = vld [vmem:[#allocation5 + $0x3b8] sm:$0xff] }
  0xe2   :  { %v661_v31 = vadd.f32 %v660_v26, %v533_v20  ;;  %v420_v20 = vsub.f32 %v164_v13, %v292_v14  ;;  %v547_v26 = vand.u32 2147483647, %v419_v15  ;;  %v177_v14 = vld [vmem:[#allocation2 + $0x3c0] sm:$0xff] }
  0xe3   :  { %v305_v15 = vld [vmem:[#allocation5 + $0x3c0] sm:$0xff] }
  0xe4   :  { %v662_v36 = vadd.f32 %v661_v31, %v534_v25  ;;  %v421_v25 = vsub.f32 %v165_v18, %v293_v19  ;;  %v548_v31 = vand.u32 2147483647, %v420_v20  ;;  %v178_v19 = vld [vmem:[#allocation2 + $0x3c8] sm:$0xff] }
  0xe5   :  { %v306_v20 = vld [vmem:[#allocation5 + $0x3c8] sm:$0xff] }
  0xe6   :  { %v663_v41 = vadd.f32 %v662_v36, %v535_v30  ;;  %v422_v30 = vsub.f32 %v166_v23, %v294_v24  ;;  %v549_v36 = vand.u32 2147483647, %v421_v25  ;;  %v179_v24 = vld [vmem:[#allocation2 + $0x3d0] sm:$0xff] }
  0xe7   :  { %v307_v25 = vld [vmem:[#allocation5 + $0x3d0] sm:$0xff] }
  0xe8   :  { %v664_v46 = vadd.f32 %v663_v41, %v536_v35  ;;  %v423_v35 = vsub.f32 %v167_v28, %v295_v29  ;;  %v550_v41 = vand.u32 2147483647, %v422_v30  ;;  %v180_v29 = vld [vmem:[#allocation2 + $0x3d8] sm:$0xff] }
  0xe9   :  { %v308_v30 = vld [vmem:[#allocation5 + $0x3d8] sm:$0xff] }
  0xea   :  { %v665_v51 = vadd.f32 %v664_v46, %v537_v40  ;;  %v424_v40 = vsub.f32 %v168_v33, %v296_v34  ;;  %v551_v46 = vand.u32 2147483647, %v423_v35  ;;  %v181_v34 = vld [vmem:[#allocation2 + $0x3e0] sm:$0xff] }
  0xeb   :  { %v309_v35 = vld [vmem:[#allocation5 + $0x3e0] sm:$0xff] }
  0xec   :  { %v666_v56 = vadd.f32 %v665_v51, %v538_v45  ;;  %v425_v45 = vsub.f32 %v169_v38, %v297_v39  ;;  %v552_v51 = vand.u32 2147483647, %v424_v40  ;;  %v182_v39 = vld [vmem:[#allocation2 + $0x3e8] sm:$0xff] }
  0xed   :  { %v310_v40 = vld [vmem:[#allocation5 + $0x3e8] sm:$0xff] }
  0xee   :  { %v667_v61 = vadd.f32 %v666_v56, %v539_v50  ;;  %v426_v50 = vsub.f32 %v170_v43, %v298_v44  ;;  %v553_v56 = vand.u32 2147483647, %v425_v45  ;;  %v183_v44 = vld [vmem:[#allocation2 + $0x3f0] sm:$0xff] }
  0xef   :  { %v311_v45 = vld [vmem:[#allocation5 + $0x3f0] sm:$0xff] }
  0xf0   :  { %v668_v2 = vadd.f32 %v667_v61, %v540_v55  ;;  %v427_v55 = vsub.f32 %v171_v48, %v299_v49  ;;  %v554_v61 = vand.u32 2147483647, %v426_v50  ;;  %v184_v49 = vld [vmem:[#allocation2 + $0x3f8] sm:$0xff] }
  0xf1   :  { %v312_v50 = vld [vmem:[#allocation5 + $0x3f8] sm:$0xff] }
  0xf2   :  { %v669_v7 = vadd.f32 %v668_v2, %v541_v60  ;;  %v428_v60 = vsub.f32 %v172_v53, %v300_v54  ;;  %v555_v2 = vand.u32 2147483647, %v427_v55  ;;  %v440_v54 = vsub.f32 %v184_v49, %v312_v50 }
  0xf4   :  { %v670_v12 = vadd.f32 %v669_v7, %v542_v1  ;;  %v429_v1 = vsub.f32 %v173_v58, %v301_v59  ;;  %v556_v7 = vand.u32 2147483647, %v428_v60  ;;  %v568_v59 = vand.u32 2147483647, %v440_v54 }
  0xf6   :  { %v671_v17 = vadd.f32 %v670_v12, %v543_v6  ;;  %v430_v6 = vsub.f32 %v174_v63, %v302_v0  ;;  %v557_v12 = vand.u32 2147483647, %v429_v1 }
  0xf8   :  { %v672_v22 = vadd.f32 %v671_v17, %v544_v11  ;;  %v431_v11 = vsub.f32 %v175_v4, %v303_v5  ;;  %v558_v17 = vand.u32 2147483647, %v430_v6 }
  0xfa   :  { %v673_v27 = vadd.f32 %v672_v22, %v545_v16  ;;  %v432_v16 = vsub.f32 %v176_v9, %v304_v10  ;;  %v559_v22 = vand.u32 2147483647, %v431_v11 }
  0xfc   :  { %v674_v32 = vadd.f32 %v673_v27, %v546_v21  ;;  %v433_v21 = vsub.f32 %v177_v14, %v305_v15  ;;  %v560_v27 = vand.u32 2147483647, %v432_v16 }
  0xfe   :  { %v675_v37 = vadd.f32 %v674_v32, %v547_v26  ;;  %v434_v26 = vsub.f32 %v178_v19, %v306_v20  ;;  %v561_v32 = vand.u32 2147483647, %v433_v21 }
 0x100   :  { %v676_v42 = vadd.f32 %v675_v37, %v548_v31  ;;  %v435_v31 = vsub.f32 %v179_v24, %v307_v25  ;;  %v562_v37 = vand.u32 2147483647, %v434_v26 }
 0x102   :  { %v677_v47 = vadd.f32 %v676_v42, %v549_v36  ;;  %v436_v36 = vsub.f32 %v180_v29, %v308_v30  ;;  %v563_v42 = vand.u32 2147483647, %v435_v31 }
 0x104   :  { %v678_v52 = vadd.f32 %v677_v47, %v550_v41  ;;  %v437_v41 = vsub.f32 %v181_v34, %v309_v35  ;;  %v564_v47 = vand.u32 2147483647, %v436_v36 }
 0x106   :  { %v679_v57 = vadd.f32 %v678_v52, %v551_v46  ;;  %v438_v46 = vsub.f32 %v182_v39, %v310_v40  ;;  %v565_v52 = vand.u32 2147483647, %v437_v41 }
 0x108   :  { %v680_v62 = vadd.f32 %v679_v57, %v552_v51  ;;  %v439_v51 = vsub.f32 %v183_v44, %v311_v45  ;;  %v566_v55 = vand.u32 2147483647, %v438_v46 }
 0x10a   :  { %v681_v3 = vadd.f32 %v680_v62, %v553_v56  ;;  %v567_v57 = vand.u32 2147483647, %v439_v51 }
 0x10c   :  { %v682_v8 = vadd.f32 %v681_v3, %v554_v61 }
 0x10e   :  { %v683_v13 = vadd.f32 %v682_v8, %v555_v2 }
 0x110   :  { %v684_v18 = vadd.f32 %v683_v13, %v556_v7 }
 0x112   :  { %v685_v23 = vadd.f32 %v684_v18, %v557_v12 }
 0x114   :  { %v686_v28 = vadd.f32 %v685_v23, %v558_v17 }
 0x116   :  { %v687_v33 = vadd.f32 %v686_v28, %v559_v22 }
 0x118   :  { %v688_v38 = vadd.f32 %v687_v33, %v560_v27 }
 0x11a   :  { %v689_v43 = vadd.f32 %v688_v38, %v561_v32 }
 0x11c   :  { %v690_v48 = vadd.f32 %v689_v43, %v562_v37 }
 0x11e   :  { %v691_v53 = vadd.f32 %v690_v48, %v563_v42 }
 0x120   :  { %v692_v56 = vadd.f32 %v691_v53, %v564_v47 }
 0x122   :  { %v693_v58 = vadd.f32 %v692_v56, %v565_v52 }
 0x124   :  { %v694_v60 = vadd.f32 %v693_v58, %v566_v55 }
 0x126   :  { %v695_v61 = vadd.f32 %v694_v60, %v567_v57 }
 0x128   :  { %v696_v62 = vadd.f32 %v695_v61, %v568_v59 }
 0x12a   :  { %698 = vst [vmem:[#allocation7] sm:$0xff] %v696_v62 }
 0x12b   :  { %776 = shalt.err (!%p773_p6)
}
 0x12c   :  { %s777_s10 = scalar_lea.hbm %s851_s2, 128 }
 0x12d   :  { %p778_p7 = scmp.ne.s32.totalorder %s851_s2, %s777_s10  ;;  %p781_p8 = scmp.lt.u32.totalorder %s777_s10, %s851_s2 }
 0x12f   :  { %p783_p9 = pnand %p781_p8, %p778_p7 }
 0x131   :  { %786 = shalt.err (!%p783_p9)
}
 0x132   :  { %708 = dma.vmem_to_hbm [thread:$0]  %s706_s6, 128, %s851_s2, [#allocation4]  }
 0x133   :  { %791 = dma.done.wait [#allocation4], 128  }
 0x134   :  { %792 = vsyncadd [#allocation4], 4294967168 }
 0x135   :  { %712 = vsyncpa [#allocation3], 1 }
 0x136   :  { %713 = vsyncpa [#allocation6], 1 }
 0x137   :  { %714 = vsyncpa [#allocation4], 1 }

</bundles_post_ra>
